<compile_context>
chip_gen: v6e
topology: v6e:2x2x1
jax: 0.10.0
libtpu: 0.0.40
codegen_flags: <defaults>
</compile_context>

<pallas_src>
import jax
import jax.numpy as jnp
from jax.experimental import pallas as pl
from jax.experimental.pallas import tpu as pltpu


def _round_up(v, m):
    return ((v + m - 1) // m) * m


def _leaky_relu(x, slope=0.2):
    return jnp.where(x >= 0, x, slope * x)


# NT dot: contract the minor dim of both operands  (lhs[1] . rhs[1]) -> (M_lhs, M_rhs)
_NT_DIMS = (((1,), (1,)), ((), ()))


def _cgan_kernel(
    x_ref, z_ref,
    # Generator params (first layer split into x / noise halves; layer-4 fused away)
    gw1x_ref, gw1n_ref, gb1_ref,
    gw2_ref, gb2_ref,
    gw3_ref, gb3_ref,
    # Discriminator params (first layer: fused gen-out half + x half)
    dwf_ref, dw1x_ref, db1_ref,
    dw2_ref, db2_ref,
    dw3_ref, db3_ref,
    dw4_ref, db4_ref,
    dw5_ref, db5_ref,            # [8, Hp] zero-padded final row + [1, 1] bias
    out_ref,                     # [1, 1, TB]  (lane-dense row per tile)
):
    f32 = jnp.float32
    cdt = gw2_ref.dtype          # bf16 compute dtype for MXU operands

    x = x_ref[...]               # already bf16 (cast in the wrapper)
    z = z_ref[...]               # f32, [TB, noise_dim]

    # ---------------- Generator ----------------
    # Layer 1: x half on the MXU; the K=3 noise half as broadcasted VPU FMAs.
    h = jnp.dot(x, gw1x_ref[...], preferred_element_type=f32) + gb1_ref[...]
    for j in range(z_ref.shape[1]):
        h = h + z[:, j:j + 1] * gw1n_ref[j:j + 1, :]
    h = _leaky_relu(h)

    h = jnp.dot(h.astype(cdt), gw2_ref[...], preferred_element_type=f32) + gb2_ref[...]
    h = _leaky_relu(h)
    h = jnp.dot(h.astype(cdt), gw3_ref[...], preferred_element_type=f32) + gb3_ref[...]
    h = _leaky_relu(h)

    # ---------------- Discriminator ----------------
    # Layer 1 with the generator output layer algebraically fused:
    #   h3 @ (gw4 @ dw1y)  +  x @ dw1x  +  (db1 + gb4 @ dw1y)
    h = (jnp.dot(h.astype(cdt), dwf_ref[...], preferred_element_type=f32)
         + jnp.dot(x, dw1x_ref[...], preferred_element_type=f32)
         + db1_ref[...])
    h = _leaky_relu(h)
    h = jnp.dot(h.astype(cdt), dw2_ref[...], preferred_element_type=f32) + db2_ref[...]
    h = _leaky_relu(h)
    h = jnp.dot(h.astype(cdt), dw3_ref[...], preferred_element_type=f32) + db3_ref[...]
    h = _leaky_relu(h)
    h = jnp.dot(h.astype(cdt), dw4_ref[...], preferred_element_type=f32) + db4_ref[...]
    h = _leaky_relu(h)

    # Final [Hp -> 1] layer, computed lane-dense:  w[8,Hp] . h[TB,Hp]^T -> [8,TB],
    # rows 1..7 of w are zero padding; row 0 is the logit row.
    logit = jax.lax.dot_general(dw5_ref[...], h.astype(cdt), _NT_DIMS,
                                preferred_element_type=f32)[0:1, :] + db5_ref[...]

    # Sigmoid: exp + approximate reciprocal on the EUP, clamp on the VPU.
    sig = pl.reciprocal(1.0 + jnp.exp(-logit), approx=True)
    out_ref[0] = jnp.clip(sig, 0.0, 1.0).astype(out_ref.dtype)   # store [1, TB] row


def init_params(key, input_size, output_size, noise_dim=3, hidden_dim=64,
                dtype=jnp.float32):
    """PyTorch-like init: uniform(+/- 1/sqrt(fan_in)) for weights and biases.
    Weights stored as [fan_in, fan_out] (W.T relative to nn.Linear)."""
    def linear(k, fan_in, fan_out):
        kw, kb = jax.random.split(k)
        bound = fan_in ** -0.5
        w = jax.random.uniform(kw, (fan_in, fan_out), dtype, -bound, bound)
        b = jax.random.uniform(kb, (1, fan_out), dtype, -bound, bound)
        return w, b

    keys = jax.random.split(key, 9)
    generator = [
        linear(keys[0], input_size + noise_dim, hidden_dim),
        linear(keys[1], hidden_dim, hidden_dim),
        linear(keys[2], hidden_dim, hidden_dim),
        linear(keys[3], hidden_dim, output_size),
    ]
    # cGAN builds Discriminator(output_size, input_size): first layer consumes
    # concat((y_fake, x)) with fan_in = output_size + input_size.
    discriminator = [
        linear(keys[4], output_size + input_size, hidden_dim),
        linear(keys[5], hidden_dim, hidden_dim),
        linear(keys[6], hidden_dim, hidden_dim),
        linear(keys[7], hidden_dim, hidden_dim),
        linear(keys[8], hidden_dim, 1),
    ]
    return {"generator": generator, "discriminator": discriminator,
            "dims": (input_size, output_size, noise_dim, hidden_dim)}


def prepare_params(params, compute_dtype=jnp.bfloat16):
    """Split first-layer weights, fuse gw4@dw1y into the discriminator first layer,
    zero-pad hidden_dim to a multiple of 128, cast MXU weights to bf16."""
    input_size, output_size, noise_dim, hidden_dim = params["dims"]
    (gw1, gb1), (gw2, gb2), (gw3, gb3), (gw4, gb4) = params["generator"]
    (dw1, db1), (dw2, db2), (dw3, db3), (dw4, db4), (dw5, db5) = params["discriminator"]

    hp = _round_up(hidden_dim, 128)
    pc = hp - hidden_dim                                      # column pad
    pad_c = lambda w: jnp.pad(w, ((0, 0), (0, pc)))           # pad fan_out -> hp
    pad_rc = lambda w: jnp.pad(w, ((0, pc), (0, pc)))         # pad both -> (hp, hp)
    c = lambda w: w.astype(compute_dtype)

    # Split concat-consuming first layers.
    gw1x, gw1n = gw1[:input_size], gw1[input_size:]           # concat((x, noise)) @ W1
    dw1y, dw1x = dw1[:output_size], dw1[output_size:]         # concat((y_fake, x)) @ W1

    # Exact algebraic fusion of gen output layer into disc first layer (forward only).
    wf = jnp.dot(gw4, dw1y)                                   # [H, H]
    db1f = db1 + jnp.dot(gb4, dw1y)                           # [1, H]

    # Final [H -> 1] layer as a zero-padded [8, hp] row for a lane-dense NT matmul.
    dw5_row = jnp.pad(dw5.reshape(1, hidden_dim), ((0, 7), (0, pc)))

    return (
        c(pad_c(gw1x)),                    # [in, hp]      bf16
        pad_c(gw1n).astype(jnp.float32),   # [noise, hp]   f32 (VPU FMAs)
        pad_c(gb1),                        # [1, hp]       f32
        c(pad_rc(gw2)), pad_c(gb2),
        c(pad_rc(gw3)), pad_c(gb3),
        c(pad_rc(wf)),                     # fused gw4@dw1y  [hp, hp] bf16
        c(pad_c(dw1x)),                    # [in, hp]      bf16
        pad_c(db1f),                       # folded bias   [1, hp] f32
        c(pad_rc(dw2)), pad_c(db2),
        c(pad_rc(dw3)), pad_c(db3),
        c(pad_rc(dw4)), pad_c(db4),
        c(dw5_row),                        # [8, hp]       bf16
        db5,                               # [1, 1]        f32
    )


def cgan_forward(x, noise, flat_params, *, block_b=2048, min_tiles=4):
    B = x.shape[0]
    # Tile: multiple of 8, capped at block_b, and small enough to give >= min_tiles
    # grid steps when B allows it (so "parallel" spans both v7x TensorCores).
    tb = max(8, _round_up((B + min_tiles - 1) // min_tiles, 8))
    tb = min(tb, block_b)
    num_tiles = (B + tb - 1) // tb

    x = x.astype(jnp.bfloat16)                 # halve the per-step streaming DMA
    noise = noise.astype(jnp.float32)

    def data_spec(cols):
        return pl.BlockSpec((tb, cols), lambda i: (i, 0))

    def param_spec(a):
        return pl.BlockSpec(a.shape, lambda i: (0,) * a.ndim)   # fully VMEM-resident

    in_specs = [data_spec(x.shape[1]), data_spec(noise.shape[1])]
    in_specs += [param_spec(a) for a in flat_params]

    out = pl.pallas_call(
        _cgan_kernel,
        out_shape=jax.ShapeDtypeStruct((num_tiles, 1, tb), jnp.float32),
        grid=(num_tiles,),
        in_specs=in_specs,
        out_specs=pl.BlockSpec((1, 1, tb), lambda i: (i, 0, 0)),   # lane-dense row
        compiler_params=pltpu.CompilerParams(
            dimension_semantics=("parallel",),   # v7x: shard batch tiles over 2 TCs
        ),
    )(x, noise, *flat_params)

    return out.reshape(-1)[:B].reshape(B, 1)


def _reference_forward(x, noise, params):
    """Pure-JAX f32 reference of the original (unfused, unpadded) module."""
    leaky = lambda v: jnp.where(v >= 0, v, 0.2 * v)
    (gw1, gb1), (gw2, gb2), (gw3, gb3), (gw4, gb4) = params["generator"]
    (dw1, db1), (dw2, db2), (dw3, db3), (dw4, db4), (dw5, db5) = params["discriminator"]
    h = jnp.concatenate([x, noise], axis=1)
    h = leaky(h @ gw1 + gb1)
    h = leaky(h @ gw2 + gb2)
    h = leaky(h @ gw3 + gb3)
    y_fake = h @ gw4 + gb4
    h = jnp.concatenate([y_fake, x], axis=1)
    h = leaky(h @ dw1 + db1)
    h = leaky(h @ dw2 + db2)
    h = leaky(h @ dw3 + db3)
    h = leaky(h @ dw4 + db4)
    return jax.nn.sigmoid(h @ dw5 + db5)


if __name__ == "__main__":
    input_size = 16    # x features
    output_size = 8    # generated y features
    noise_dim = 3
    hidden_dim = 64    # padded to 128 inside prepare_params
    batch = 32         # small demo batch -> 4 grid tiles of 8 rows

    key = jax.random.PRNGKey(0)
    k_x, k_n, k_p = jax.random.split(key, 3)
    x = jax.random.normal(k_x, (batch, input_size), jnp.float32)
    noise = jax.random.normal(k_n, (batch, noise_dim), jnp.float32)

    params = init_params(k_p, input_size, output_size,
                         noise_dim=noise_dim, hidden_dim=hidden_dim)
    flat = prepare_params(params)

    fwd = jax.jit(cgan_forward)
    validity = fwd(x, noise, flat)
    jax.block_until_ready(validity)

    assert validity.shape == (batch, 1)
    assert bool(jnp.all((validity >= 0.0) & (validity <= 1.0)))

    # bf16 weights + approx reciprocal: compare with a loose tolerance, not bitwise.
    ref = _reference_forward(x, noise, params)
    assert bool(jnp.all(jnp.abs(validity - ref) < 5e-2)), "mismatch vs f32 reference"

    print("KERNEL_OK")
</pallas_src>

<mosaic_0001>
module attributes {stable_mosaic.version = 11 : i64} {
  func.func @_cgan_kernel(%arg0: i32, %arg1: memref<8x16xbf16, #tpu.memory_space<vmem>>, %arg2: memref<8x3xf32, #tpu.memory_space<vmem>>, %arg3: memref<16x128xbf16, #tpu.memory_space<vmem>>, %arg4: memref<3x128xf32, #tpu.memory_space<vmem>>, %arg5: memref<1x128xf32, #tpu.memory_space<vmem>>, %arg6: memref<128x128xbf16, #tpu.memory_space<vmem>>, %arg7: memref<1x128xf32, #tpu.memory_space<vmem>>, %arg8: memref<128x128xbf16, #tpu.memory_space<vmem>>, %arg9: memref<1x128xf32, #tpu.memory_space<vmem>>, %arg10: memref<128x128xbf16, #tpu.memory_space<vmem>>, %arg11: memref<16x128xbf16, #tpu.memory_space<vmem>>, %arg12: memref<1x128xf32, #tpu.memory_space<vmem>>, %arg13: memref<128x128xbf16, #tpu.memory_space<vmem>>, %arg14: memref<1x128xf32, #tpu.memory_space<vmem>>, %arg15: memref<128x128xbf16, #tpu.memory_space<vmem>>, %arg16: memref<1x128xf32, #tpu.memory_space<vmem>>, %arg17: memref<128x128xbf16, #tpu.memory_space<vmem>>, %arg18: memref<1x128xf32, #tpu.memory_space<vmem>>, %arg19: memref<8x128xbf16, #tpu.memory_space<vmem>>, %arg20: memref<1x1xf32, #tpu.memory_space<vmem>>, %arg21: memref<1x1x8xf32, #tpu.memory_space<vmem>>) attributes {dimension_semantics = [#tpu.dimension_semantics<parallel>], iteration_bounds = array<i64: 4>, scalar_prefetch = 0 : i64, scratch_operands = 0 : i64, tpu.core_type = #tpu.core_type<tc>, window_params = [{transform_indices = @transform_0, window_bounds = array<i64: 8, 16>}, {transform_indices = @transform_1, window_bounds = array<i64: 8, 3>}, {pipeline_mode = #tpu.pipeline_mode<synchronous>, transform_indices = @transform_2, window_bounds = array<i64: 16, 128>}, {pipeline_mode = #tpu.pipeline_mode<synchronous>, transform_indices = @transform_3, window_bounds = array<i64: 3, 128>}, {pipeline_mode = #tpu.pipeline_mode<synchronous>, transform_indices = @transform_4, window_bounds = array<i64: 1, 128>}, {pipeline_mode = #tpu.pipeline_mode<synchronous>, transform_indices = @transform_5, window_bounds = array<i64: 128, 128>}, {pipeline_mode = #tpu.pipeline_mode<synchronous>, transform_indices = @transform_6, window_bounds = array<i64: 1, 128>}, {pipeline_mode = #tpu.pipeline_mode<synchronous>, transform_indices = @transform_7, window_bounds = array<i64: 128, 128>}, {pipeline_mode = #tpu.pipeline_mode<synchronous>, transform_indices = @transform_8, window_bounds = array<i64: 1, 128>}, {pipeline_mode = #tpu.pipeline_mode<synchronous>, transform_indices = @transform_9, window_bounds = array<i64: 128, 128>}, {pipeline_mode = #tpu.pipeline_mode<synchronous>, transform_indices = @transform_10, window_bounds = array<i64: 16, 128>}, {pipeline_mode = #tpu.pipeline_mode<synchronous>, transform_indices = @transform_11, window_bounds = array<i64: 1, 128>}, {pipeline_mode = #tpu.pipeline_mode<synchronous>, transform_indices = @transform_12, window_bounds = array<i64: 128, 128>}, {pipeline_mode = #tpu.pipeline_mode<synchronous>, transform_indices = @transform_13, window_bounds = array<i64: 1, 128>}, {pipeline_mode = #tpu.pipeline_mode<synchronous>, transform_indices = @transform_14, window_bounds = array<i64: 128, 128>}, {pipeline_mode = #tpu.pipeline_mode<synchronous>, transform_indices = @transform_15, window_bounds = array<i64: 1, 128>}, {pipeline_mode = #tpu.pipeline_mode<synchronous>, transform_indices = @transform_16, window_bounds = array<i64: 128, 128>}, {pipeline_mode = #tpu.pipeline_mode<synchronous>, transform_indices = @transform_17, window_bounds = array<i64: 1, 128>}, {pipeline_mode = #tpu.pipeline_mode<synchronous>, transform_indices = @transform_18, window_bounds = array<i64: 8, 128>}, {pipeline_mode = #tpu.pipeline_mode<synchronous>, transform_indices = @transform_19, window_bounds = array<i64: 1, 1>}, {transform_indices = @transform_20, window_bounds = array<i64: 1, 1, 8>}]} {
    %c0 = arith.constant 0 : index
    %c0_0 = arith.constant 0 : index
    %0 = vector.load %arg1[%c0, %c0_0] : memref<8x16xbf16, #tpu.memory_space<vmem>>, vector<8x16xbf16>
    %c0_1 = arith.constant 0 : index
    %c0_2 = arith.constant 0 : index
    %1 = vector.load %arg2[%c0_1, %c0_2] : memref<8x3xf32, #tpu.memory_space<vmem>>, vector<8x3xf32>
    %c0_3 = arith.constant 0 : index
    %c0_4 = arith.constant 0 : index
    %2 = vector.load %arg3[%c0_3, %c0_4] : memref<16x128xbf16, #tpu.memory_space<vmem>>, vector<16x128xbf16>
    %cst = arith.constant dense<0.000000e+00> : vector<8x128xf32>
    %3 = tpu.matmul %0, %2, %cst {dimension_numbers = #tpu.dot_dimension_numbers<[1], [0], [0], [1], [0, 0, 1, 1], [], []>} : vector<8x16xbf16>, vector<16x128xbf16>, vector<8x128xf32> -> vector<8x128xf32>
    %c0_5 = arith.constant 0 : index
    %c0_6 = arith.constant 0 : index
    %4 = vector.load %arg5[%c0_5, %c0_6] : memref<1x128xf32, #tpu.memory_space<vmem>>, vector<1x128xf32>
    %5 = vector.broadcast %4 : vector<1x128xf32> to vector<8x128xf32>
    %6 = arith.addf %3, %5 : vector<8x128xf32>
    %7 = vector.extract_strided_slice %1 {offsets = [0, 0], sizes = [8, 1], strides = [1, 1]} : vector<8x3xf32> to vector<8x1xf32>
    %c0_7 = arith.constant 0 : index
    %c0_8 = arith.constant 0 : index
    %8 = vector.load %arg4[%c0_7, %c0_8] : memref<3x128xf32, #tpu.memory_space<vmem>>, vector<1x128xf32>
    %9 = vector.broadcast %7 : vector<8x1xf32> to vector<8x128xf32>
    %10 = vector.broadcast %8 : vector<1x128xf32> to vector<8x128xf32>
    %11 = arith.mulf %9, %10 : vector<8x128xf32>
    %12 = arith.addf %6, %11 : vector<8x128xf32>
    %13 = vector.extract_strided_slice %1 {offsets = [0, 1], sizes = [8, 1], strides = [1, 1]} : vector<8x3xf32> to vector<8x1xf32>
    %c1 = arith.constant 1 : index
    %c0_9 = arith.constant 0 : index
    %14 = vector.load %arg4[%c1, %c0_9] : memref<3x128xf32, #tpu.memory_space<vmem>>, vector<1x128xf32>
    %15 = vector.broadcast %13 : vector<8x1xf32> to vector<8x128xf32>
    %16 = vector.broadcast %14 : vector<1x128xf32> to vector<8x128xf32>
    %17 = arith.mulf %15, %16 : vector<8x128xf32>
    %18 = arith.addf %12, %17 : vector<8x128xf32>
    %19 = vector.extract_strided_slice %1 {offsets = [0, 2], sizes = [8, 1], strides = [1, 1]} : vector<8x3xf32> to vector<8x1xf32>
    %c2 = arith.constant 2 : index
    %c0_10 = arith.constant 0 : index
    %20 = vector.load %arg4[%c2, %c0_10] : memref<3x128xf32, #tpu.memory_space<vmem>>, vector<1x128xf32>
    %21 = vector.broadcast %19 : vector<8x1xf32> to vector<8x128xf32>
    %22 = vector.broadcast %20 : vector<1x128xf32> to vector<8x128xf32>
    %23 = arith.mulf %21, %22 : vector<8x128xf32>
    %24 = arith.addf %18, %23 : vector<8x128xf32>
    %cst_11 = arith.constant 0.000000e+00 : f32
    %25 = vector.broadcast %cst_11 : f32 to vector<8x128xf32>
    %26 = arith.cmpf oge, %24, %25 : vector<8x128xf32>
    %cst_12 = arith.constant 2.000000e-01 : f32
    %27 = vector.broadcast %cst_12 : f32 to vector<8x128xf32>
    %28 = arith.mulf %27, %24 : vector<8x128xf32>
    %29 = arith.select %26, %24, %28 : vector<8x128xi1>, vector<8x128xf32>
    %30 = arith.truncf %29 : vector<8x128xf32> to vector<8x128xbf16>
    %c0_13 = arith.constant 0 : index
    %c0_14 = arith.constant 0 : index
    %31 = vector.load %arg6[%c0_13, %c0_14] : memref<128x128xbf16, #tpu.memory_space<vmem>>, vector<128x128xbf16>
    %cst_15 = arith.constant dense<0.000000e+00> : vector<8x128xf32>
    %32 = tpu.matmul %30, %31, %cst_15 {dimension_numbers = #tpu.dot_dimension_numbers<[1], [0], [0], [1], [0, 0, 1, 1], [], []>} : vector<8x128xbf16>, vector<128x128xbf16>, vector<8x128xf32> -> vector<8x128xf32>
    %c0_16 = arith.constant 0 : index
    %c0_17 = arith.constant 0 : index
    %33 = vector.load %arg7[%c0_16, %c0_17] : memref<1x128xf32, #tpu.memory_space<vmem>>, vector<1x128xf32>
    %34 = vector.broadcast %33 : vector<1x128xf32> to vector<8x128xf32>
    %35 = arith.addf %32, %34 : vector<8x128xf32>
    %cst_18 = arith.constant 0.000000e+00 : f32
    %36 = vector.broadcast %cst_18 : f32 to vector<8x128xf32>
    %37 = arith.cmpf oge, %35, %36 : vector<8x128xf32>
    %cst_19 = arith.constant 2.000000e-01 : f32
    %38 = vector.broadcast %cst_19 : f32 to vector<8x128xf32>
    %39 = arith.mulf %38, %35 : vector<8x128xf32>
    %40 = arith.select %37, %35, %39 : vector<8x128xi1>, vector<8x128xf32>
    %41 = arith.truncf %40 : vector<8x128xf32> to vector<8x128xbf16>
    %c0_20 = arith.constant 0 : index
    %c0_21 = arith.constant 0 : index
    %42 = vector.load %arg8[%c0_20, %c0_21] : memref<128x128xbf16, #tpu.memory_space<vmem>>, vector<128x128xbf16>
    %cst_22 = arith.constant dense<0.000000e+00> : vector<8x128xf32>
    %43 = tpu.matmul %41, %42, %cst_22 {dimension_numbers = #tpu.dot_dimension_numbers<[1], [0], [0], [1], [0, 0, 1, 1], [], []>} : vector<8x128xbf16>, vector<128x128xbf16>, vector<8x128xf32> -> vector<8x128xf32>
    %c0_23 = arith.constant 0 : index
    %c0_24 = arith.constant 0 : index
    %44 = vector.load %arg9[%c0_23, %c0_24] : memref<1x128xf32, #tpu.memory_space<vmem>>, vector<1x128xf32>
    %45 = vector.broadcast %44 : vector<1x128xf32> to vector<8x128xf32>
    %46 = arith.addf %43, %45 : vector<8x128xf32>
    %cst_25 = arith.constant 0.000000e+00 : f32
    %47 = vector.broadcast %cst_25 : f32 to vector<8x128xf32>
    %48 = arith.cmpf oge, %46, %47 : vector<8x128xf32>
    %cst_26 = arith.constant 2.000000e-01 : f32
    %49 = vector.broadcast %cst_26 : f32 to vector<8x128xf32>
    %50 = arith.mulf %49, %46 : vector<8x128xf32>
    %51 = arith.select %48, %46, %50 : vector<8x128xi1>, vector<8x128xf32>
    %52 = arith.truncf %51 : vector<8x128xf32> to vector<8x128xbf16>
    %c0_27 = arith.constant 0 : index
    %c0_28 = arith.constant 0 : index
    %53 = vector.load %arg10[%c0_27, %c0_28] : memref<128x128xbf16, #tpu.memory_space<vmem>>, vector<128x128xbf16>
    %cst_29 = arith.constant dense<0.000000e+00> : vector<8x128xf32>
    %54 = tpu.matmul %52, %53, %cst_29 {dimension_numbers = #tpu.dot_dimension_numbers<[1], [0], [0], [1], [0, 0, 1, 1], [], []>} : vector<8x128xbf16>, vector<128x128xbf16>, vector<8x128xf32> -> vector<8x128xf32>
    %c0_30 = arith.constant 0 : index
    %c0_31 = arith.constant 0 : index
    %55 = vector.load %arg11[%c0_30, %c0_31] : memref<16x128xbf16, #tpu.memory_space<vmem>>, vector<16x128xbf16>
    %cst_32 = arith.constant dense<0.000000e+00> : vector<8x128xf32>
    %56 = tpu.matmul %0, %55, %cst_32 {dimension_numbers = #tpu.dot_dimension_numbers<[1], [0], [0], [1], [0, 0, 1, 1], [], []>} : vector<8x16xbf16>, vector<16x128xbf16>, vector<8x128xf32> -> vector<8x128xf32>
    %57 = arith.addf %54, %56 : vector<8x128xf32>
    %c0_33 = arith.constant 0 : index
    %c0_34 = arith.constant 0 : index
    %58 = vector.load %arg12[%c0_33, %c0_34] : memref<1x128xf32, #tpu.memory_space<vmem>>, vector<1x128xf32>
    %59 = vector.broadcast %58 : vector<1x128xf32> to vector<8x128xf32>
    %60 = arith.addf %57, %59 : vector<8x128xf32>
    %cst_35 = arith.constant 0.000000e+00 : f32
    %61 = vector.broadcast %cst_35 : f32 to vector<8x128xf32>
    %62 = arith.cmpf oge, %60, %61 : vector<8x128xf32>
    %cst_36 = arith.constant 2.000000e-01 : f32
    %63 = vector.broadcast %cst_36 : f32 to vector<8x128xf32>
    %64 = arith.mulf %63, %60 : vector<8x128xf32>
    %65 = arith.select %62, %60, %64 : vector<8x128xi1>, vector<8x128xf32>
    %66 = arith.truncf %65 : vector<8x128xf32> to vector<8x128xbf16>
    %c0_37 = arith.constant 0 : index
    %c0_38 = arith.constant 0 : index
    %67 = vector.load %arg13[%c0_37, %c0_38] : memref<128x128xbf16, #tpu.memory_space<vmem>>, vector<128x128xbf16>
    %cst_39 = arith.constant dense<0.000000e+00> : vector<8x128xf32>
    %68 = tpu.matmul %66, %67, %cst_39 {dimension_numbers = #tpu.dot_dimension_numbers<[1], [0], [0], [1], [0, 0, 1, 1], [], []>} : vector<8x128xbf16>, vector<128x128xbf16>, vector<8x128xf32> -> vector<8x128xf32>
    %c0_40 = arith.constant 0 : index
    %c0_41 = arith.constant 0 : index
    %69 = vector.load %arg14[%c0_40, %c0_41] : memref<1x128xf32, #tpu.memory_space<vmem>>, vector<1x128xf32>
    %70 = vector.broadcast %69 : vector<1x128xf32> to vector<8x128xf32>
    %71 = arith.addf %68, %70 : vector<8x128xf32>
    %cst_42 = arith.constant 0.000000e+00 : f32
    %72 = vector.broadcast %cst_42 : f32 to vector<8x128xf32>
    %73 = arith.cmpf oge, %71, %72 : vector<8x128xf32>
    %cst_43 = arith.constant 2.000000e-01 : f32
    %74 = vector.broadcast %cst_43 : f32 to vector<8x128xf32>
    %75 = arith.mulf %74, %71 : vector<8x128xf32>
    %76 = arith.select %73, %71, %75 : vector<8x128xi1>, vector<8x128xf32>
    %77 = arith.truncf %76 : vector<8x128xf32> to vector<8x128xbf16>
    %c0_44 = arith.constant 0 : index
    %c0_45 = arith.constant 0 : index
    %78 = vector.load %arg15[%c0_44, %c0_45] : memref<128x128xbf16, #tpu.memory_space<vmem>>, vector<128x128xbf16>
    %cst_46 = arith.constant dense<0.000000e+00> : vector<8x128xf32>
    %79 = tpu.matmul %77, %78, %cst_46 {dimension_numbers = #tpu.dot_dimension_numbers<[1], [0], [0], [1], [0, 0, 1, 1], [], []>} : vector<8x128xbf16>, vector<128x128xbf16>, vector<8x128xf32> -> vector<8x128xf32>
    %c0_47 = arith.constant 0 : index
    %c0_48 = arith.constant 0 : index
    %80 = vector.load %arg16[%c0_47, %c0_48] : memref<1x128xf32, #tpu.memory_space<vmem>>, vector<1x128xf32>
    %81 = vector.broadcast %80 : vector<1x128xf32> to vector<8x128xf32>
    %82 = arith.addf %79, %81 : vector<8x128xf32>
    %cst_49 = arith.constant 0.000000e+00 : f32
    %83 = vector.broadcast %cst_49 : f32 to vector<8x128xf32>
    %84 = arith.cmpf oge, %82, %83 : vector<8x128xf32>
    %cst_50 = arith.constant 2.000000e-01 : f32
    %85 = vector.broadcast %cst_50 : f32 to vector<8x128xf32>
    %86 = arith.mulf %85, %82 : vector<8x128xf32>
    %87 = arith.select %84, %82, %86 : vector<8x128xi1>, vector<8x128xf32>
    %88 = arith.truncf %87 : vector<8x128xf32> to vector<8x128xbf16>
    %c0_51 = arith.constant 0 : index
    %c0_52 = arith.constant 0 : index
    %89 = vector.load %arg17[%c0_51, %c0_52] : memref<128x128xbf16, #tpu.memory_space<vmem>>, vector<128x128xbf16>
    %cst_53 = arith.constant dense<0.000000e+00> : vector<8x128xf32>
    %90 = tpu.matmul %88, %89, %cst_53 {dimension_numbers = #tpu.dot_dimension_numbers<[1], [0], [0], [1], [0, 0, 1, 1], [], []>} : vector<8x128xbf16>, vector<128x128xbf16>, vector<8x128xf32> -> vector<8x128xf32>
    %c0_54 = arith.constant 0 : index
    %c0_55 = arith.constant 0 : index
    %91 = vector.load %arg18[%c0_54, %c0_55] : memref<1x128xf32, #tpu.memory_space<vmem>>, vector<1x128xf32>
    %92 = vector.broadcast %91 : vector<1x128xf32> to vector<8x128xf32>
    %93 = arith.addf %90, %92 : vector<8x128xf32>
    %cst_56 = arith.constant 0.000000e+00 : f32
    %94 = vector.broadcast %cst_56 : f32 to vector<8x128xf32>
    %95 = arith.cmpf oge, %93, %94 : vector<8x128xf32>
    %cst_57 = arith.constant 2.000000e-01 : f32
    %96 = vector.broadcast %cst_57 : f32 to vector<8x128xf32>
    %97 = arith.mulf %96, %93 : vector<8x128xf32>
    %98 = arith.select %95, %93, %97 : vector<8x128xi1>, vector<8x128xf32>
    %c0_58 = arith.constant 0 : index
    %c0_59 = arith.constant 0 : index
    %99 = vector.load %arg19[%c0_58, %c0_59] : memref<8x128xbf16, #tpu.memory_space<vmem>>, vector<8x128xbf16>
    %100 = arith.truncf %98 : vector<8x128xf32> to vector<8x128xbf16>
    %cst_60 = arith.constant dense<0.000000e+00> : vector<8x8xf32>
    %101 = tpu.matmul %99, %100, %cst_60 {dimension_numbers = #tpu.dot_dimension_numbers<[1], [1], [0], [0], [0, 0, 1, 0], [], []>} : vector<8x128xbf16>, vector<8x128xbf16>, vector<8x8xf32> -> vector<8x8xf32>
    %102 = vector.extract_strided_slice %101 {offsets = [0, 0], sizes = [1, 8], strides = [1, 1]} : vector<8x8xf32> to vector<1x8xf32>
    %c0_61 = arith.constant 0 : index
    %c0_62 = arith.constant 0 : index
    %103 = vector.load %arg20[%c0_61, %c0_62] : memref<1x1xf32, #tpu.memory_space<vmem>>, vector<1x1xf32>
    %104 = vector.broadcast %103 : vector<1x1xf32> to vector<1x8xf32>
    %105 = arith.addf %102, %104 : vector<1x8xf32>
    %cst_63 = arith.constant 0.000000e+00 : f32
    %106 = vector.broadcast %cst_63 : f32 to vector<1x8xf32>
    %107 = arith.subf %106, %105 : vector<1x8xf32>
    %108 = math.exp %107 : vector<1x8xf32>
    %cst_64 = arith.constant 1.000000e+00 : f32
    %109 = vector.broadcast %cst_64 : f32 to vector<1x8xf32>
    %110 = arith.addf %109, %108 : vector<1x8xf32>
    %111 = tpu.reciprocal %110 {approx = true} : vector<1x8xf32> -> vector<1x8xf32>
    %cst_65 = arith.constant 0.000000e+00 : f32
    %cst_66 = arith.constant 1.000000e+00 : f32
    %112 = vector.broadcast %cst_65 : f32 to vector<1x8xf32>
    %113 = arith.maximumf %112, %111 : vector<1x8xf32>
    %114 = vector.broadcast %cst_66 : f32 to vector<1x8xf32>
    %115 = arith.minimumf %114, %113 : vector<1x8xf32>
    %c0_67 = arith.constant 0 : index
    %c0_68 = arith.constant 0 : index
    %c0_69 = arith.constant 0 : index
    %116 = vector.load %arg21[%c0_67, %c0_68, %c0_69] : memref<1x1x8xf32, #tpu.memory_space<vmem>>, vector<1x1x8xf32>
    %117 = vector.shape_cast %116 : vector<1x1x8xf32> to vector<1x8xf32>
    %118 = vector.shape_cast %115 : vector<1x8xf32> to vector<1x1x8xf32>
    tpu.vector_store %arg21[%c0_67, %c0_68, %c0_69], %118 {strides = array<i32>} : memref<1x1x8xf32, #tpu.memory_space<vmem>>, vector<1x1x8xf32>,
    return
  }
  func.func @transform_0(%arg0: i32) -> (i32, i32) {
    %c0_i32 = arith.constant 0 : i32
    %c0_i32_0 = arith.constant 0 : i32
    return %arg0, %c0_i32 : i32, i32
  }
  func.func @transform_1(%arg0: i32) -> (i32, i32) {
    %c0_i32 = arith.constant 0 : i32
    %c0_i32_0 = arith.constant 0 : i32
    return %arg0, %c0_i32 : i32, i32
  }
  func.func @transform_2(%arg0: i32) -> (i32, i32) {
    %c0_i32 = arith.constant 0 : i32
    %c0_i32_0 = arith.constant 0 : i32
    %c0_i32_1 = arith.constant 0 : i32
    return %c0_i32, %c0_i32_0 : i32, i32
  }
  func.func @transform_3(%arg0: i32) -> (i32, i32) {
    %c0_i32 = arith.constant 0 : i32
    %c0_i32_0 = arith.constant 0 : i32
    %c0_i32_1 = arith.constant 0 : i32
    return %c0_i32, %c0_i32_0 : i32, i32
  }
  func.func @transform_4(%arg0: i32) -> (i32, i32) {
    %c0_i32 = arith.constant 0 : i32
    %c0_i32_0 = arith.constant 0 : i32
    %c0_i32_1 = arith.constant 0 : i32
    return %c0_i32, %c0_i32_0 : i32, i32
  }
  func.func @transform_5(%arg0: i32) -> (i32, i32) {
    %c0_i32 = arith.constant 0 : i32
    %c0_i32_0 = arith.constant 0 : i32
    %c0_i32_1 = arith.constant 0 : i32
    return %c0_i32, %c0_i32_0 : i32, i32
  }
  func.func @transform_6(%arg0: i32) -> (i32, i32) {
    %c0_i32 = arith.constant 0 : i32
    %c0_i32_0 = arith.constant 0 : i32
    %c0_i32_1 = arith.constant 0 : i32
    return %c0_i32, %c0_i32_0 : i32, i32
  }
  func.func @transform_7(%arg0: i32) -> (i32, i32) {
    %c0_i32 = arith.constant 0 : i32
    %c0_i32_0 = arith.constant 0 : i32
    %c0_i32_1 = arith.constant 0 : i32
    return %c0_i32, %c0_i32_0 : i32, i32
  }
  func.func @transform_8(%arg0: i32) -> (i32, i32) {
    %c0_i32 = arith.constant 0 : i32
    %c0_i32_0 = arith.constant 0 : i32
    %c0_i32_1 = arith.constant 0 : i32
    return %c0_i32, %c0_i32_0 : i32, i32
  }
  func.func @transform_9(%arg0: i32) -> (i32, i32) {
    %c0_i32 = arith.constant 0 : i32
    %c0_i32_0 = arith.constant 0 : i32
    %c0_i32_1 = arith.constant 0 : i32
    return %c0_i32, %c0_i32_0 : i32, i32
  }
  func.func @transform_10(%arg0: i32) -> (i32, i32) {
    %c0_i32 = arith.constant 0 : i32
    %c0_i32_0 = arith.constant 0 : i32
    %c0_i32_1 = arith.constant 0 : i32
    return %c0_i32, %c0_i32_0 : i32, i32
  }
  func.func @transform_11(%arg0: i32) -> (i32, i32) {
    %c0_i32 = arith.constant 0 : i32
    %c0_i32_0 = arith.constant 0 : i32
    %c0_i32_1 = arith.constant 0 : i32
    return %c0_i32, %c0_i32_0 : i32, i32
  }
  func.func @transform_12(%arg0: i32) -> (i32, i32) {
    %c0_i32 = arith.constant 0 : i32
    %c0_i32_0 = arith.constant 0 : i32
    %c0_i32_1 = arith.constant 0 : i32
    return %c0_i32, %c0_i32_0 : i32, i32
  }
  func.func @transform_13(%arg0: i32) -> (i32, i32) {
    %c0_i32 = arith.constant 0 : i32
    %c0_i32_0 = arith.constant 0 : i32
    %c0_i32_1 = arith.constant 0 : i32
    return %c0_i32, %c0_i32_0 : i32, i32
  }
  func.func @transform_14(%arg0: i32) -> (i32, i32) {
    %c0_i32 = arith.constant 0 : i32
    %c0_i32_0 = arith.constant 0 : i32
    %c0_i32_1 = arith.constant 0 : i32
    return %c0_i32, %c0_i32_0 : i32, i32
  }
  func.func @transform_15(%arg0: i32) -> (i32, i32) {
    %c0_i32 = arith.constant 0 : i32
    %c0_i32_0 = arith.constant 0 : i32
    %c0_i32_1 = arith.constant 0 : i32
    return %c0_i32, %c0_i32_0 : i32, i32
  }
  func.func @transform_16(%arg0: i32) -> (i32, i32) {
    %c0_i32 = arith.constant 0 : i32
    %c0_i32_0 = arith.constant 0 : i32
    %c0_i32_1 = arith.constant 0 : i32
    return %c0_i32, %c0_i32_0 : i32, i32
  }
  func.func @transform_17(%arg0: i32) -> (i32, i32) {
    %c0_i32 = arith.constant 0 : i32
    %c0_i32_0 = arith.constant 0 : i32
    %c0_i32_1 = arith.constant 0 : i32
    return %c0_i32, %c0_i32_0 : i32, i32
  }
  func.func @transform_18(%arg0: i32) -> (i32, i32) {
    %c0_i32 = arith.constant 0 : i32
    %c0_i32_0 = arith.constant 0 : i32
    %c0_i32_1 = arith.constant 0 : i32
    return %c0_i32, %c0_i32_0 : i32, i32
  }
  func.func @transform_19(%arg0: i32) -> (i32, i32) {
    %c0_i32 = arith.constant 0 : i32
    %c0_i32_0 = arith.constant 0 : i32
    %c0_i32_1 = arith.constant 0 : i32
    return %c0_i32, %c0_i32_0 : i32, i32
  }
  func.func @transform_20(%arg0: i32) -> (i32, i32, i32) {
    %c0_i32 = arith.constant 0 : i32
    %c0_i32_0 = arith.constant 0 : i32
    %c0_i32_1 = arith.constant 0 : i32
    return %arg0, %c0_i32, %c0_i32_0 : i32, i32, i32
  }
}

</mosaic_0001>

<bundles_post_ra>
// kernel: cgan_forward.1
= control target key start
LH: loop header
LB: loop body
LE: loop exit
PB: predicated region body
PF: predicated region fallthrough
CT: control target
= control target key end

     0   :  { %s2665_s0 = inlined_call_operand.vmem [shape: bf16[32,16], index: 0, kind: input, shape index: {}]   ;;  %s2666_s1 = inlined_call_operand.vmem [shape: f32[32,3], index: 1, kind: input, shape index: {}]   ;;  %s2667_s2 = inlined_call_operand.vmem [shape: bf16[16,128], index: 2, kind: input, shape index: {}]   ;;  %s2668_s3 = inlined_call_operand.vmem [shape: f32[3,128], index: 3, kind: input, shape index: {}]   ;;  %s2669_s4 = inlined_call_operand.vmem [shape: f32[1,128], index: 4, kind: input, shape index: {}]   ;;  %s2670_s5 = inlined_call_operand.vmem [shape: bf16[128,128], index: 5, kind: input, shape index: {}]   ;;  %s2671_s6 = inlined_call_operand.vmem [shape: f32[1,128], index: 6, kind: input, shape index: {}]   ;;  %s2672_s7 = inlined_call_operand.hbm [shape: bf16[128,128], index: 7, kind: input, shape index: {}]   ;;  %s2673_s8 = inlined_call_operand.vmem [shape: f32[1,128], index: 8, kind: input, shape index: {}]   ;;  %s2674_s9 = inlined_call_operand.hbm [shape: bf16[128,128], index: 9, kind: input, shape index: {}]   ;;  %s2675_s10 = inlined_call_operand.vmem [shape: bf16[16,128], index: 10, kind: input, shape index: {}]   ;;  %s2676_s11 = inlined_call_operand.vmem [shape: f32[1,128], index: 11, kind: input, shape index: {}]   ;;  %s2677_s12 = inlined_call_operand.hbm [shape: bf16[128,128], index: 12, kind: input, shape index: {}]   ;;  %s2678_s13 = inlined_call_operand.vmem [shape: f32[1,128], index: 13, kind: input, shape index: {}]   ;;  %s2679_s14 = inlined_call_operand.hbm [shape: bf16[128,128], index: 14, kind: input, shape index: {}]   ;;  %s2680_s15 = inlined_call_operand.vmem [shape: f32[1,128], index: 15, kind: input, shape index: {}]   ;;  %s2681_s16 = inlined_call_operand.hbm [shape: bf16[128,128], index: 16, kind: input, shape index: {}]   ;;  %s2682_s17 = inlined_call_operand.vmem [shape: f32[1,128], index: 17, kind: input, shape index: {}]   ;;  %s2683_s18 = inlined_call_operand.vmem [shape: bf16[8,128], index: 18, kind: input, shape index: {}]   ;;  %s2684_s19 = inlined_call_operand.<no memory space> [shape: f32[1,1], index: 19, kind: input, shape index: {}]   ;;  %s2685_s20 = inlined_call_operand.vmem [shape: f32[4,1,8], index: 20, kind: output, shape index: {}]  }
   0x1   :  { %2687 = sst [smem:[#allocation14_spill]] %s2665_s0  ;;  %v25_v0 = vstv %s2684_s19 }
   0x2   :  { %2688 = sst [smem:[#allocation15_spill]] %s2666_s1  ;;  %26 = vst [vmem:[#allocation2] sm:$0x1] %v25_v0 }
   0x3   :  { %2689 = sst [smem:[#allocation16_spill]] %s2667_s2 }
   0x4   :  { %2690 = sst [smem:[#allocation17_spill]] %s2668_s3 }
   0x5   :  { %2691 = sst [smem:[#allocation18_spill]] %s2669_s4 }
   0x6   :  { %2692 = sst [smem:[#allocation19_spill]] %s2672_s7 }
   0x7   :  { %27 = vsyncpa [#allocation4], 0 }
   0x8   :  { %28 = vsyncpa [#allocation6], 0 }
   0x9   :  { %29 = vsyncpa [#allocation9], 0  ;;  %s2398_s23 = smov 0  }
   0xa LB: > { %s2404_s24 = sadd.s32 4294967295, %s2276_s23   ;;  %p1726_p0 = scmp.ge.s32.totalorder %s2276_s23, 1  ;;  %s2276_s23 = sphi %s2398_s23, %s35_s23  }
   0xb   : > { %p496_p1 = scmp.lt.s32.totalorder %s2276_s23, 5  ;;  %p2039_p2 = scmp.eq.s32.totalorder %s2404_s24, 0 }
   0xc   : > { %s2278_s2 = smov [#allocation5]   ;;  %s2279_s3 = smov [#allocation8]  }
   0xd   : > { %p2409_p3 = pnand %p1726_p0, %p496_p1  ;;  %s539_s25 = sshll.u32 %s2278_s2, 4  ;;  %s540_s25 = int_to_ptr.vmem [resolvable:$true] %s539_s25 }
   0xe   : > { %s574_s26 = sshll.u32 %s2279_s3, 4  ;;  %s2280_s28 = smov [#allocation3]   ;;  %s2415_s26 = int_to_ptr.vmem [resolvable:$true] %s574_s26 }
   0xf   : > { %p2023_p4 = pneg %p2409_p3  ;;  %s523_s4 = sshll.u32 %s2280_s28, 4  ;;  %s2423_s4 = int_to_ptr.vmem [resolvable:$true] %s523_s4 }
  0x10   : > { %s2281_s29 = smov [#allocation7]   ;;  %s2139_s21 = scalar_lea.vmem %s540_s25, 1024 }
  0x11   : > { %p2419_p5 = pnand %p2039_p2, %p2023_p4  ;;  %s2425_s30 = sshll.u32 %s2281_s29, 4  ;;  %s559_s30 = int_to_ptr.vmem [resolvable:$true] %s2425_s30 }
  0x12   : > { %p2140_p7 = scmp.ne.s32.totalorder %s540_s25, %s2139_s21  ;;  %p2147_p10 = scmp.lt.s32.totalorder %s540_s25, %s540_s25 }
  0x13   : > { %p2429_p6 = pneg %p2419_p5  ;;  %p2148_p11 = scmp.lt.s32.totalorder %s2139_s21, %s2139_s21 }
  0x15   : > { %p2142_p8 = pnand %p2140_p7, %p2429_p6  ;;  %p2149_p12 = por %p2148_p11, %p2147_p10 }
  0x17   : > { %p2143_p9 = pneg %p2142_p8 }
  0x19   : > { %p2150_p13 = pnand %p2149_p12, %p2143_p9 }
  0x1b   : > { %2153 = shalt.err (!%p2150_p13)
}
  0x1c   : > { %s2282_s1 = smov 64   ;;  %s2283_s22 = smov 4  }
  0x1d   : > { %2029 = dma.hbm_to_vmem [thread:$0]  (!%p2419_p5), %s2674_s9, 1024, %s540_s25, [#allocation6], %s2282_s1, %s2282_s1, %s2283_s22  }
  0x1e   : > { %s2165_s28 = scalar_lea.vmem %s2415_s26, 1024  ;;  %p2173_p7 = scmp.lt.s32.totalorder %s2415_s26, %s2415_s26 }
  0x1f   : > { %p2166_p0 = scmp.ne.s32.totalorder %s2415_s26, %s2165_s28  ;;  %p2174_p8 = scmp.lt.s32.totalorder %s2165_s28, %s2165_s28 }
  0x21   : > { %p2168_p1 = pnand %p2166_p0, %p2429_p6  ;;  %p2175_p9 = por %p2174_p8, %p2173_p7 }
  0x23   : > { %p2169_p4 = pneg %p2168_p1 }
  0x25   : > { %p2176_p10 = pnand %p2175_p9, %p2169_p4 }
  0x27   : > { %2179 = shalt.err (!%p2176_p10)
}
  0x28   : > { %2035 = dma.hbm_to_vmem [thread:$0]  (!%p2419_p5), %s2679_s14, 1024, %s2415_s26, [#allocation9], %s2282_s1, %s2282_s1, %s2283_s22  }
  0x29   : > { %s2191_s25 = scalar_lea.vmem %s2423_s4, 1024  ;;  %p2199_p0 = scmp.lt.s32.totalorder %s2423_s4, %s2423_s4 }
  0x2a   : > { %p2192_p11 = scmp.ne.s32.totalorder %s2423_s4, %s2191_s25  ;;  %p2200_p1 = scmp.lt.s32.totalorder %s2191_s25, %s2191_s25 }
  0x2c   : > { %p2194_p12 = pnand %p2192_p11, %p2429_p6  ;;  %p2201_p4 = por %p2200_p1, %p2199_p0 }
  0x2e   : > { %p2195_p13 = pneg %p2194_p12 }
  0x30   : > { %p2202_p7 = pnand %p2201_p4, %p2195_p13 }
  0x32   : > { %2205 = shalt.err (!%p2202_p7)
}
  0x33   : > { %s2696_s7 = sld [smem:[#allocation19_spill]]  ;;  %s2217_s26 = scalar_lea.vmem %s559_s30, 1024 }
  0x34   : > { %p2218_p8 = scmp.ne.s32.totalorder %s559_s30, %s2217_s26  ;;  %p2225_p11 = scmp.lt.s32.totalorder %s559_s30, %s559_s30 }
  0x35   : > { %p2226_p12 = scmp.lt.s32.totalorder %s2217_s26, %s2217_s26 }
  0x36   : > { %p2220_p9 = pnand %p2218_p8, %p2429_p6 }
  0x37   : > { %p2227_p13 = por %p2226_p12, %p2225_p11 }
  0x38   : > { %p2221_p10 = pneg %p2220_p9 }
  0x39   : > { %2026 = dma.hbm_to_vmem [thread:$0]  (!%p2419_p5), %s2696_s7, 1024, %s2423_s4, [#allocation4], %s2282_s1, %s2282_s1, %s2283_s22  }
  0x3a   : > { %p2228_p0 = pnand %p2227_p13, %p2221_p10 }
  0x3c   : > { %2231 = shalt.err (!%p2228_p0)
}
  0x3d   : > { %2032 = dma.hbm_to_vmem [thread:$0]  (!%p2419_p5), %s2677_s12, 1024, %s559_s30, [#allocation6], %s2282_s1, %s2282_s1, %s2283_s22  }
  0x3e   : > { %s2284_s4 = smov [#allocation10]  }
  0x3f   : > { %s590_s21 = sshll.u32 %s2284_s4, 4  ;;  %s591_s21 = int_to_ptr.vmem [resolvable:$true] %s590_s21 }
  0x40   : > { %s2243_s25 = scalar_lea.vmem %s591_s21, 1024  ;;  %p2251_p8 = scmp.lt.s32.totalorder %s591_s21, %s591_s21 }
  0x41   : > { %p2244_p1 = scmp.ne.s32.totalorder %s591_s21, %s2243_s25  ;;  %p2252_p9 = scmp.lt.s32.totalorder %s2243_s25, %s2243_s25 }
  0x43   : > { %p2246_p4 = pnand %p2244_p1, %p2429_p6  ;;  %p2253_p10 = por %p2252_p9, %p2251_p8 }
  0x45   : > { %p2247_p7 = pneg %p2246_p4 }
  0x47   : > { %p2254_p11 = pnand %p2253_p10, %p2247_p7 }
  0x49   : > { %2257 = shalt.err (!%p2254_p11)
}
  0x4a   : > { %2038 = dma.hbm_to_vmem [thread:$0]  (!%p2419_p5), %s2681_s16, 1024, %s591_s21, [#allocation9], %s2282_s1, %s2282_s1, %s2283_s22  }
  0x4b   : > { %629 = sbr.rel (%p2409_p3) target bundleno = 1748 (0x6d4), region = 100 }
  0x50   : > { %2263 = dma.done.wait (%p2039_p2), [#allocation4], 1024  }
  0x51   : > { %2265 = vsyncadd (%p2039_p2), [#allocation4], 4294966272 }
  0x52   : > { %2267 = dma.done.wait (%p2039_p2), [#allocation6], 2048  }
  0x53   : > { %2269 = vsyncadd (%p2039_p2), [#allocation6], 4294965248 }
  0x54   : > { %2271 = dma.done.wait (%p2039_p2), [#allocation9], 2048  }
  0x55   : > { %2273 = vsyncadd (%p2039_p2), [#allocation9], 4294965248  ;;  %p704_p3 = scmp.lt.s32.totalorder %s2404_s24, 3  ;;  %v2285_v1 = vmov 0.0   ;;  %vm2286_vm0 = vmmov 0   ;;  %v2287_v2 = vmov 0  }
  0x56   : > { %1865 = vmatprep.subr.bf16.mxu0 %v2285_v1  ;;  %1867 = vmatprep.mubr.msk.bf16.mxu0 %vm2286_vm0, %v2285_v1  ;;  %v2288_v3 = vmov 2   ;;  %s2697_s1 = sld [smem:[#allocation14_spill]]  ;;  %vm733_vm1 = vcmask 130048   ;;  %v2075_v7 = vld [vmem:[%s2670_s5 + $0x38] sm:$0xff]   ;;  %v2076_v8 = vld [vmem:[%s2670_s5 + $0x30] sm:$0xff]   ;;  %v2289_v9 = vmov 1  }
  0x57   : > { %s2703_s24 = smov (!%p704_p3, %s2404_s24), 3  ;;  %2069 = vset.pattern.permute.xlu0 %v2287_v2  ;;  %2071 = vset.pattern.permute.xlu1 %v2288_v3  ;;  %s2698_s29 = sld [smem:[#allocation15_spill]]  ;;  %v2077_v10 = vld [vmem:[%s2670_s5 + $0x28] sm:$0xff]   ;;  %v2078_v11 = vld [vmem:[%s2670_s5 + $0x20] sm:$0xff]   ;;  %v2079_v12 = vld [vmem:[%s2670_s5 + $0x18] sm:$0xff]   ;;  %vm1613_vm9 = vcmask 57344  }
  0x58   : > { %1871 = vmatprep.subr.bf16.mxu1 %v2285_v1  ;;  %1887 = vmatprep.mubr.msk.bf16.mxu1 %vm2286_vm0, %v2285_v1  ;;  %s1739_s19 = sshll.u32 %s2703_s24, 2  ;;  %s1740_s3 = sshll.u32 %s2703_s24, 3  ;;  %v2080_v13 = vld [vmem:[%s2670_s5 + $0x10] sm:$0xff]   ;;  %v2081_v14 = vld [vmem:[%s2670_s5 + $0x8] sm:$0xff]   ;;  %v2082_v15 = vld [vmem:[%s2670_s5] sm:$0xff]  }
  0x59   : > { %s2699_s2 = sld [smem:[#allocation16_spill]]  ;;  %1872 = vmatpush3.bf16.msra.mxu1 %v2075_v7  ;;  %v2083_v16 = vld [vmem:[#allocation3 + $0x38] sm:$0xff]   ;;  %v2084_v17 = vld [vmem:[#allocation3 + $0x30] sm:$0xff]   ;;  %v2085_v18 = vld [vmem:[#allocation3 + $0x28] sm:$0xff]  }
  0x5a   : > { %1873 = vmatprep.subr.bf16.mxu1 %v2285_v1  ;;  %v2086_v19 = vld [vmem:[#allocation3 + $0x20] sm:$0xff]   ;;  %v2087_v20 = vld [vmem:[#allocation3 + $0x18] sm:$0xff]   ;;  %v2088_v21 = vld [vmem:[#allocation3 + $0x10] sm:$0xff]   ;;  %s2700_s27 = sld [smem:[#allocation17_spill]] }
  0x5b   : > { %v2089_v43 = vld [vmem:[#allocation3 + $0x8] sm:$0xff]   ;;  %v2090_v44 = vld [vmem:[#allocation3] sm:$0xff]   ;;  %v1747_v46 = vld [vmem:[%s2671_s6] ss:$0 sm:$0xff] }
  0x5c   : > { %s707_s22 = scalar_lea.vmem %s2697_s1, %s1739_s19  ;;  %s2701_s1 = sld [smem:[#allocation18_spill]]  ;;  %v2097_v45 = vld [vmem:[%s2675_s10] sm:$0xff]   ;;  %v2092_v56 = vld [vmem:[#allocation5 + $0x30] sm:$0xff]   ;;  %v2093_v57 = vld [vmem:[#allocation5 + $0x28] sm:$0xff]  }
  0x5d   : > { %s711_s4 = scalar_lea.vmem %s2698_s29, %s1740_s3  ;;  %v2529_v5 = vld [vmem:[%s707_s22] sm:$0xf]  ;;  %1874 = vmatpush3.bf16.msra.mxu1 %v2076_v8  ;;  %v2096_v60 = vld [vmem:[#allocation5 + $0x10] sm:$0xff]   ;;  %v2098_v61 = vld [vmem:[#allocation5 + $0x8] sm:$0xff]  }
  0x5e   : > { %v717_v6 = vld [vmem:[%s711_s4] sm:$0xff]  ;;  %1875 = vmatprep.subr.bf16.mxu1 %v2285_v1  ;;  %v2101_v0 = vld [vmem:[#allocation7 + $0x30] sm:$0xff]  }
  0x5f   : > { %v2074_v4 = vld [vmem:[%s2699_s2] sm:$0xff]   ;;  %780 = vperm.xlu0 %2069, %v717_v6   ;;  %802 = vperm.xlu1 %2071, %v717_v6   ;;  %s714_s2 = scalar_lea.vmem %s2685_s20, %s2703_s24 }
  0x60   : > { %1866 = vmatpush3.bf16.msra.mxu0 %v2074_v4  ;;  %v1744_v23 = vld [vmem:[%s2700_s27] ss:$0 sm:$0xff]  ;;  %v1745_v25 = vld [vmem:[%s2700_s27 + $0x1] ss:$0 sm:$0xff]  ;;  %v1746_v28 = vld [vmem:[%s2700_s27 + $0x2] ss:$0 sm:$0xff] }
  0x61   : > { %1891 = vmatprep.subr.bf16.mxu0 %v2285_v1  ;;  %1876 = vmatpush3.bf16.msra.mxu1 %v2077_v10  ;;  %v2091_v53 = vld [vmem:[#allocation5 + $0x38] sm:$0xff]   ;;  %v2094_v58 = vld [vmem:[#allocation5 + $0x20] sm:$0xff]  }
  0x62   : > { %1877 = vmatprep.subr.bf16.mxu1 %v2285_v1  ;;  %v1741_v24 = vld [vmem:[%s2701_s1] ss:$0 sm:$0xff]  ;;  %v2099_v62 = vld [vmem:[#allocation5] sm:$0xff]  }
  0x63   : > { %1868 = vmatmul.mubr.msk.bf16.vlgmr.msra.gmra.mxu0 %vm733_vm1, %v2529_v5  ;;  %2070 = vset.pattern.permute.xlu0 %v2289_v9  ;;  %v2095_v59 = vld [vmem:[#allocation5 + $0x18] sm:$0xff]   ;;  %v2103_v3 = vld [vmem:[#allocation7 + $0x20] sm:$0xff]  }
  0x64   : > { %1907 = vmatprep.mubr.msk.bf16.mxu0 %vm2286_vm0, %v2285_v1  ;;  %791 = vperm.xlu0 %2070, %v717_v6   ;;  %v2100_v63 = vld [vmem:[#allocation7 + $0x38] sm:$0xff]   ;;  %v2105_v6 = vld [vmem:[#allocation7 + $0x10] sm:$0xff]  }
  0x65   : > { %2072 = vset.pattern.permute.xlu1 %v2287_v2  ;;  %1878 = vmatpush3.bf16.msra.mxu1 %v2078_v11  ;;  %v2104_v4 = vld [vmem:[#allocation7 + $0x18] sm:$0xff]  }
  0x66   : > { %1879 = vmatprep.subr.bf16.mxu1 %v2285_v1  ;;  %1892 = vmatpush3.bf16.msra.mxu0 %v2083_v16  ;;  %v1756_v10 = vld [vmem:[%s2673_s8] ss:$0 sm:$0xff] }
  0x67   : > { %1893 = vmatprep.subr.bf16.mxu0 %v2285_v1 }
  0x68   : > { %2073 = vset.pattern.permute.xlu0 %v2287_v2  ;;  %v2102_v2 = vld [vmem:[#allocation7 + $0x28] sm:$0xff]  }
  0x69   : > { %1880 = vmatpush3.bf16.msra.mxu1 %v2079_v12 }
  0x6a   : > { %1881 = vmatprep.subr.bf16.mxu1 %v2285_v1  ;;  %1894 = vmatpush3.bf16.msra.mxu0 %v2084_v17 }
  0x6b   : > { %1895 = vmatprep.subr.bf16.mxu0 %v2285_v1 }
  0x6d   : > { %1882 = vmatpush3.bf16.msra.mxu1 %v2080_v13 }
  0x6e   : > { %1883 = vmatprep.subr.bf16.mxu1 %v2285_v1  ;;  %1896 = vmatpush3.bf16.msra.mxu0 %v2085_v18 }
  0x6f   : > { %1897 = vmatprep.subr.bf16.mxu0 %v2285_v1 }
  0x71   : > { %1884 = vmatpush3.bf16.msra.mxu1 %v2081_v14 }
  0x72   : > { %1885 = vmatprep.subr.bf16.mxu1 %v2285_v1  ;;  %1898 = vmatpush3.bf16.msra.mxu0 %v2086_v19  ;;  %v2106_v19 = vld [vmem:[#allocation7 + $0x8] sm:$0xff]  }
  0x73   : > { %1899 = vmatprep.subr.bf16.mxu0 %v2285_v1 }
  0x75   : > { %1886 = vmatpush3.bf16.msra.mxu1 %v2082_v15 }
  0x76   : > { %1911 = vmatprep.subr.bf16.mxu1 %v2285_v1  ;;  %1900 = vmatpush3.bf16.msra.mxu0 %v2087_v20  ;;  %v2107_v20 = vld [vmem:[#allocation7] sm:$0xff]  }
  0x77   : > { %1901 = vmatprep.subr.bf16.mxu0 %v2285_v1 }
  0x7a   : > { %1902 = vmatpush3.bf16.msra.mxu0 %v2088_v21  ;;  %v2108_v21 = vld [vmem:[#allocation8 + $0x38] sm:$0xff]  }
  0x7b   : > { %1903 = vmatprep.subr.bf16.mxu0 %v2285_v1 }
  0x7e   : > { %1904 = vmatpush3.bf16.msra.mxu0 %v2089_v43  ;;  %v2120_v43 = vld [vmem:[#allocation10 + $0x18] sm:$0xff]  }
  0x7f   : > { %1905 = vmatprep.subr.bf16.mxu0 %v2285_v1 }
  0x82   : > { %1906 = vmatpush3.bf16.msra.mxu0 %v2090_v44  ;;  %v2121_v44 = vld [vmem:[#allocation10 + $0x10] sm:$0xff]  }
  0x83   : > { %1917 = vmatprep.subr.bf16.mxu0 %v2285_v1 }
  0xda   : > { %v781_v22 = vpop.permute.xlu0 %780  ;;  %v803_v29 = vpop.permute.xlu1 %802 }
  0xdb   : > { %v787_v30 = vmul.f32 %v1744_v23, %v781_v22  ;;  %v809_v35 = vmul.f32 %v1746_v28, %v803_v29  ;;  %v2109_v22 = vld [vmem:[#allocation8 + $0x30] sm:$0xff]   ;;  %v2110_v23 = vld [vmem:[#allocation8 + $0x28] sm:$0xff]   ;;  %v1775_v28 = vld [vmem:[%s2676_s11] ss:$0 sm:$0xff] }
  0xdf   : > { %v792_v26 = vpop.permute.xlu0 %791 }
  0xe0   : > { %v798_v32 = vmul.f32 %v1745_v25, %v792_v26  ;;  %v2112_v25 = vld [vmem:[#allocation8 + $0x18] sm:$0xff]   ;;  %v2113_v26 = vld [vmem:[#allocation8 + $0x10] sm:$0xff]  }
 0x123   : > { %v771_v27 = vpop.f32.mrf.mxu0 }
 0x124   : > { %v772_v31 = vadd.f32 %v1741_v24, %v771_v27  ;;  %v2111_v24 = vld [vmem:[#allocation8 + $0x20] sm:$0xff]  }
 0x125   : > { %v1869_v33 = vpop.f32.mrf.mxu0 }
 0x126   : > { %v788_v34 = vadd.f32 %v787_v30, %v772_v31 }
 0x127   : > { %v774_v36 = vpop.f32.mrf.mxu0 }
 0x128   : > { %v799_v37 = vadd.f32 %v798_v32, %v788_v34 }
 0x129   : > { %v1870_v38 = vpop.f32.mrf.mxu0 }
 0x12a   : > { %v810_v39 = vadd.f32 %v809_v35, %v799_v37  ;;  %v2114_v37 = vld [vmem:[#allocation8 + $0x8] sm:$0xff]   ;;  %v2115_v38 = vld [vmem:[#allocation8] sm:$0xff]  }
 0x12c   : > { %v812_v40 = vmul.f32 0.2, %v810_v39  ;;  %vm811_vm2 = vcmp.ge.f32.partialorder %v810_v39, 0.0 }
 0x12e   : > { %v813_v41 = vsel %vm811_vm2, %v810_v39, %v812_v40  ;;  %v2116_v39 = vld [vmem:[#allocation10 + $0x38] sm:$0xff]   ;;  %v2117_v40 = vld [vmem:[#allocation10 + $0x30] sm:$0xff]  }
 0x12f   : > { %v814_v42 = vpack.c.bf16 %v813_v41, %v813_v41  ;;  %v2118_v41 = vld [vmem:[#allocation10 + $0x28] sm:$0xff]  }
 0x131   : > { %1888 = vmatmul.mubr.bf16.vlgmr.msra.gmra.mxu1 %v814_v42  ;;  %v2119_v42 = vld [vmem:[#allocation10 + $0x20] sm:$0xff]  }
 0x132   : > { %1913 = vmatprep.mubr.msk.bf16.mxu1 %vm2286_vm0, %v2285_v1  ;;  %1912 = vmatpush3.bf16.msra.mxu1 %v2097_v45  ;;  %v1776_v45 = vld [vmem:[%s2678_s13] ss:$0 sm:$0xff] }
 0x133   : > { %1937 = vmatprep.subr.bf16.mxu1 %v2285_v1 }
 0x139   : > { %1914 = vmatmul.mubr.msk.bf16.vlgmr.msra.gmra.mxu1 %vm733_vm1, %v2529_v5 }
 0x13a   : > { %1953 = vmatprep.mubr.msk.bf16.mxu1 %vm2286_vm0, %v2285_v1  ;;  %1938 = vmatpush3.bf16.msra.mxu1 %v2100_v63 }
 0x13b   : > { %1939 = vmatprep.subr.bf16.mxu1 %v2285_v1 }
 0x13e   : > { %1940 = vmatpush3.bf16.msra.mxu1 %v2101_v0 }
 0x13f   : > { %1941 = vmatprep.subr.bf16.mxu1 %v2285_v1 }
 0x142   : > { %1942 = vmatpush3.bf16.msra.mxu1 %v2102_v2  ;;  %v1595_v2 = vld [vmem:[#allocation2] sm:$0x1] }
 0x143   : > { %1943 = vmatprep.subr.bf16.mxu1 %v2285_v1  ;;  %1598 = vperm.xlu1 %2072, %v1595_v2  }
 0x146   : > { %1944 = vmatpush3.bf16.msra.mxu1 %v2103_v3 }
 0x147   : > { %1945 = vmatprep.subr.bf16.mxu1 %v2285_v1 }
 0x14a   : > { %1946 = vmatpush3.bf16.msra.mxu1 %v2104_v4 }
 0x14b   : > { %1947 = vmatprep.subr.bf16.mxu1 %v2285_v1 }
 0x14e   : > { %1948 = vmatpush3.bf16.msra.mxu1 %v2105_v6 }
 0x14f   : > { %1949 = vmatprep.subr.bf16.mxu1 %v2285_v1 }
 0x152   : > { %1950 = vmatpush3.bf16.msra.mxu1 %v2106_v19 }
 0x153   : > { %1951 = vmatprep.subr.bf16.mxu1 %v2285_v1 }
 0x156   : > { %1952 = vmatpush3.bf16.msra.mxu1 %v2107_v20 }
 0x157   : > { %1977 = vmatprep.subr.bf16.mxu1 %v2285_v1 }
 0x1f1   : > { %v920_v47 = vpop.f32.mrf.mxu1 }
 0x1f2   : > { %v921_v48 = vadd.f32 %v1747_v46, %v920_v47 }
 0x1f3   : > { %v1889_v49 = vpop.f32.mrf.mxu1 }
 0x1f4   : > { %vm926_vm3 = vcmp.ge.f32.partialorder %v921_v48, 0.0  ;;  %v927_v50 = vmul.f32 0.2, %v921_v48 }
 0x1f5   : > { %v923_v51 = vpop.f32.mrf.mxu1 }
 0x1f6   : > { %v928_v52 = vsel %vm926_vm3, %v921_v48, %v927_v50 }
 0x1f7   : > { %v929_v54 = vpack.c.bf16 %v928_v52, %v928_v52  ;;  %v1890_v55 = vpop.f32.mrf.mxu1 }
 0x1f8   : > { %v2123_v55 = vld [vmem:[#allocation10] sm:$0xff]  }
 0x1f9   : > { %1908 = vmatmul.mubr.bf16.vlgmr.msra.gmra.mxu0 %v929_v54  ;;  %v1103_v5 = vpop.f32.mrf.mxu1  ;;  %v2122_v54 = vld [vmem:[#allocation10 + $0x8] sm:$0xff]  }
 0x1fa   : > { %1918 = vmatpush3.bf16.msra.mxu0 %v2091_v53  ;;  %1933 = vmatprep.mubr.msk.bf16.mxu0 %vm2286_vm0, %v2285_v1 }
 0x1fb   : > { %1919 = vmatprep.subr.bf16.mxu0 %v2285_v1  ;;  %v1915_v7 = vpop.f32.mrf.mxu1 }
 0x1fd   : > { %v1106_v8 = vpop.f32.mrf.mxu1 }
 0x1fe   : > { %1920 = vmatpush3.bf16.msra.mxu0 %v2092_v56  ;;  %v1785_v56 = vld [vmem:[%s2680_s15] ss:$0 sm:$0xff] }
 0x1ff   : > { %1921 = vmatprep.subr.bf16.mxu0 %v2285_v1  ;;  %v1916_v9 = vpop.f32.mrf.mxu1 }
 0x202   : > { %1922 = vmatpush3.bf16.msra.mxu0 %v2093_v57 }
 0x203   : > { %1923 = vmatprep.subr.bf16.mxu0 %v2285_v1 }
 0x206   : > { %1924 = vmatpush3.bf16.msra.mxu0 %v2094_v58 }
 0x207   : > { %1925 = vmatprep.subr.bf16.mxu0 %v2285_v1 }
 0x20a   : > { %1926 = vmatpush3.bf16.msra.mxu0 %v2095_v59 }
 0x20b   : > { %1927 = vmatprep.subr.bf16.mxu0 %v2285_v1 }
 0x20e   : > { %1928 = vmatpush3.bf16.msra.mxu0 %v2096_v60 }
 0x20f   : > { %1929 = vmatprep.subr.bf16.mxu0 %v2285_v1 }
 0x212   : > { %1930 = vmatpush3.bf16.msra.mxu0 %v2098_v61 }
 0x213   : > { %1931 = vmatprep.subr.bf16.mxu0 %v2285_v1 }
 0x216   : > { %1932 = vmatpush3.bf16.msra.mxu0 %v2099_v62 }
 0x217   : > { %1957 = vmatprep.subr.bf16.mxu0 %v2285_v1 }
 0x2b9   : > { %v1035_v11 = vpop.f32.mrf.mxu0 }
 0x2ba   : > { %v1036_v12 = vadd.f32 %v1756_v10, %v1035_v11  ;;  %v1553_v11 = vld [vmem:[%s2683_s18] sm:$0xf] }
 0x2bb   : > { %v1909_v13 = vpop.f32.mrf.mxu0 }
 0x2bc   : > { %vm1041_vm4 = vcmp.ge.f32.partialorder %v1036_v12, 0.0  ;;  %v1042_v14 = vmul.f32 0.2, %v1036_v12 }
 0x2bd   : > { %v1038_v15 = vpop.f32.mrf.mxu0 }
 0x2be   : > { %v1043_v16 = vsel %vm1041_vm4, %v1036_v12, %v1042_v14  ;;  %v1601_v12 = vlaneseq  ;;  %v1599_v15 = vpop.permute.xlu1 %1598 }
 0x2bf   : > { %v1044_v17 = vpack.c.bf16 %v1043_v16, %v1043_v16  ;;  %v1910_v18 = vpop.f32.mrf.mxu0 }
 0x2c0   : > { %v1602_v13 = vshrl.u32 %v1601_v12, 7 }
 0x2c1   : > { %1934 = vmatmul.mubr.bf16.vlgmr.msra.gmra.mxu0 %v1044_v17 }
 0x2c2   : > { %1973 = vmatprep.mubr.msk.bf16.mxu0 %vm2286_vm0, %v2285_v1  ;;  %1958 = vmatpush3.bf16.msra.mxu0 %v2108_v21  ;;  %v1603_v14 = vsub.s32 0, %v1602_v13 }
 0x2c3   : > { %1959 = vmatprep.subr.bf16.mxu0 %v2285_v1 }
 0x2c4   : > { %v1604_v16 = vrot.slane %v1599_v15, %v1603_v14 }
 0x2c6   : > { %1960 = vmatpush3.bf16.msra.mxu0 %v2109_v22 }
 0x2c7   : > { %1961 = vmatprep.subr.bf16.mxu0 %v2285_v1 }
 0x2ca   : > { %1962 = vmatpush3.bf16.msra.mxu0 %v2110_v23 }
 0x2cb   : > { %1963 = vmatprep.subr.bf16.mxu0 %v2285_v1 }
 0x2ce   : > { %1964 = vmatpush3.bf16.msra.mxu0 %v2111_v24 }
 0x2cf   : > { %1965 = vmatprep.subr.bf16.mxu0 %v2285_v1 }
 0x2d2   : > { %1966 = vmatpush3.bf16.msra.mxu0 %v2112_v25 }
 0x2d3   : > { %1967 = vmatprep.subr.bf16.mxu0 %v2285_v1 }
 0x2d6   : > { %1968 = vmatpush3.bf16.msra.mxu0 %v2113_v26 }
 0x2d7   : > { %1969 = vmatprep.subr.bf16.mxu0 %v2285_v1 }
 0x2da   : > { %1970 = vmatpush3.bf16.msra.mxu0 %v2114_v37 }
 0x2db   : > { %1971 = vmatprep.subr.bf16.mxu0 %v2285_v1 }
 0x2de   : > { %1972 = vmatpush3.bf16.msra.mxu0 %v2115_v38 }
 0x2df   : > { %1997 = vmatprep.subr.bf16.mxu0 %v2285_v1 }
 0x381   : > { %v1191_v27 = vpop.f32.mrf.mxu0 }
 0x382   : > { %v1192_v29 = vadd.f32 %v1191_v27, %v1103_v5 }
 0x383   : > { %v1935_v30 = vpop.f32.mrf.mxu0 }
 0x384   : > { %v1204_v31 = vadd.f32 %v1775_v28, %v1192_v29 }
 0x385   : > { %v1194_v32 = vpop.f32.mrf.mxu0 }
 0x386   : > { %vm1205_vm5 = vcmp.ge.f32.partialorder %v1204_v31, 0.0  ;;  %v1206_v33 = vmul.f32 0.2, %v1204_v31 }
 0x387   : > { %v1936_v34 = vpop.f32.mrf.mxu0 }
 0x388   : > { %v1207_v35 = vsel %vm1205_vm5, %v1204_v31, %v1206_v33 }
 0x389   : > { %v1208_v36 = vpack.c.bf16 %v1207_v35, %v1207_v35 }
 0x38b   : > { %1954 = vmatmul.mubr.bf16.vlgmr.msra.gmra.mxu1 %v1208_v36 }
 0x38c   : > { %1993 = vmatprep.mubr.msk.bf16.mxu1 %vm2286_vm0, %v2285_v1  ;;  %1978 = vmatpush3.bf16.msra.mxu1 %v2116_v39 }
 0x38d   : > { %1979 = vmatprep.subr.bf16.mxu1 %v2285_v1 }
 0x390   : > { %1980 = vmatpush3.bf16.msra.mxu1 %v2117_v40 }
 0x391   : > { %1981 = vmatprep.subr.bf16.mxu1 %v2285_v1 }
 0x394   : > { %1982 = vmatpush3.bf16.msra.mxu1 %v2118_v41 }
 0x395   : > { %1983 = vmatprep.subr.bf16.mxu1 %v2285_v1 }
 0x398   : > { %1984 = vmatpush3.bf16.msra.mxu1 %v2119_v42 }
 0x399   : > { %1985 = vmatprep.subr.bf16.mxu1 %v2285_v1 }
 0x39c   : > { %1986 = vmatpush3.bf16.msra.mxu1 %v2120_v43 }
 0x39d   : > { %1987 = vmatprep.subr.bf16.mxu1 %v2285_v1 }
 0x3a0   : > { %1988 = vmatpush3.bf16.msra.mxu1 %v2121_v44 }
 0x3a1   : > { %1989 = vmatprep.subr.bf16.mxu1 %v2285_v1 }
 0x3a4   : > { %1990 = vmatpush3.bf16.msra.mxu1 %v2122_v54 }
 0x3a5   : > { %1991 = vmatprep.subr.bf16.mxu1 %v2285_v1 }
 0x3a8   : > { %1992 = vmatpush3.bf16.msra.mxu1 %v2123_v55 }
 0x44b   : > { %v1314_v46 = vpop.f32.mrf.mxu1 }
 0x44c   : > { %v1315_v47 = vadd.f32 %v1776_v45, %v1314_v46 }
 0x44d   : > { %v1955_v48 = vpop.f32.mrf.mxu1 }
 0x44e   : > { %vm1320_vm6 = vcmp.ge.f32.partialorder %v1315_v47, 0.0  ;;  %v1321_v49 = vmul.f32 0.2, %v1315_v47 }
 0x44f   : > { %v1317_v50 = vpop.f32.mrf.mxu1 }
 0x450   : > { %v1322_v51 = vsel %vm1320_vm6, %v1315_v47, %v1321_v49 }
 0x451   : > { %v1323_v52 = vpack.c.bf16 %v1322_v51, %v1322_v51  ;;  %v1956_v53 = vpop.f32.mrf.mxu1 }
 0x453   : > { %1974 = vmatmul.mubr.bf16.vlgmr.msra.gmra.mxu0 %v1323_v52 }
 0x454   : > { %1999 = vmatprep.mubr.msk.bf16.mxu0 %vm2286_vm0, %v2285_v1  ;;  %v1794_v1 = vld [vmem:[%s2682_s17] ss:$0 sm:$0xff] }
 0x513   : > { %v1429_v57 = vpop.f32.mrf.mxu0 }
 0x514   : > { %v1430_v58 = vadd.f32 %v1785_v56, %v1429_v57 }
 0x515   : > { %v1975_v59 = vpop.f32.mrf.mxu0 }
 0x516   : > { %vm1435_vm7 = vcmp.ge.f32.partialorder %v1430_v58, 0.0  ;;  %v1436_v60 = vmul.f32 0.2, %v1430_v58 }
 0x517   : > { %v1432_v61 = vpop.f32.mrf.mxu0 }
 0x518   : > { %v1437_v62 = vsel %vm1435_vm7, %v1430_v58, %v1436_v60 }
 0x519   : > { %v1438_v63 = vpack.c.bf16 %v1437_v62, %v1437_v62  ;;  %v1976_v0 = vpop.f32.mrf.mxu0 }
 0x51b   : > { %1994 = vmatmul.mubr.bf16.vlgmr.msra.gmra.mxu1 %v1438_v63 }
 0x5db   : > { %v1544_v3 = vpop.f32.mrf.mxu1 }
 0x5dc   : > { %v1545_v4 = vadd.f32 %v1794_v1, %v1544_v3 }
 0x5dd   : > { %v1995_v5 = vpop.f32.mrf.mxu1 }
 0x5de   : > { %vm1550_vm8 = vcmp.ge.f32.partialorder %v1545_v4, 0.0  ;;  %v1551_v6 = vmul.f32 0.2, %v1545_v4 }
 0x5df   : > { %v1547_v7 = vpop.f32.mrf.mxu1 }
 0x5e0   : > { %v1552_v8 = vsel %vm1550_vm8, %v1545_v4, %v1551_v6 }
 0x5e1   : > { %v1554_v9 = vpack.c.bf16 %v1552_v8, %v1552_v8  ;;  %v1996_v10 = vpop.f32.mrf.mxu1 }
 0x5e3   : > { %1998 = vmatpush3.bf16.xpose.msra.mxu0 %v1554_v9 }
 0x5ea   : > { %2000 = vmatmul.mubr.bf16.vlgmr.msra.gmra.mxu0 %v1553_v11 }
 0x6aa   : > { %v1589_v17 = vpop.f32.mrf.mxu0 }
 0x6ab   : > { %v1605_v18 = vadd.f32 %v1604_v16, %v1589_v17 }
 0x6ac   : > { %v2001_v19 = vpop.f32.mrf.mxu0 }
 0x6ad   : > { %v1606_v20 = vsub.f32 0.0, %v1605_v18 }
 0x6ae   : > { %v1592_v21 = vpop.f32.mrf.mxu0 }
 0x6af   : > { %v1607_v22 = vmul.f32 1.442695, %v1606_v20 }
 0x6b0   : > { %v2002_v23 = vpop.f32.mrf.mxu0 }
 0x6b1   : > { %2124 = vpow2.f32 %v1607_v22 }
 0x6be   : > { %v2125_v24 = vpop.eup %2124 }
 0x6bf   : > { %v1609_v25 = vadd.f32 1.0, %v2125_v24 }
 0x6c1   : > { %2126 = vrcp.f32 %v1609_v25 }
 0x6ce   : > { %v2127_v26 = vpop.eup %2126 }
 0x6cf   : > { %v1611_v27 = vmax.f32 %v2127_v26, 0.0 }
 0x6d1   : > { %v1612_v28 = vmin.f32 %v1611_v27, 1.0 }
 0x6d3   : > { %1614 = vst.msk [vmem:[%s714_s2] sm:$0x1] %vm1613_vm9, %v1612_v28 }
 0x6d4 PF: > { %s35_s23 = sadd.s32 1, %s2276_s23  }
 0x6d5   : > { %p32_p2 = scmp.ge.s32.totalorder %s35_s23, 6  }
 0x6d7   :  { %34 = sbr.rel (!%p32_p2) target bundleno = 10 (0xa), region = 154 }
 0x6dc   :  { %1632 = vsyncpa [#allocation4], 1 }
 0x6dd   :  { %1634 = vsyncpa [#allocation4 + $0x1], 1 }
 0x6de   :  { %1635 = vsyncpa [#allocation6], 1 }
 0x6df   :  { %1636 = vsyncpa [#allocation9], 1 }

</bundles_post_ra>
